<compile_context>
chip_gen: v6e
topology: v6e:2x2x1
jax: 0.10.0
libtpu: 0.0.40
codegen_flags: <defaults>
</compile_context>

<pallas_src>
import jax
import jax.numpy as jnp
from jax import lax
from jax.experimental import pallas as pl
from jax.experimental.pallas import tpu as pltpu

_LANES = 128
_MAX_TILE_ROWS = 8192          # 4 MiB per f32 tile; 8 MiB double-buffered.
_SPLIT_MIN_ROWS = 4 * _MAX_TILE_ROWS   # only split when each core gets >= 2 tiles


def _round_up(x: int, m: int) -> int:
    return (x + m - 1) // m * m


def _choose_tiling(rows: int):
    """Pick (num_splits, tiles_per_split, tile_r) for a (rows, 128) stream.

    rows is a multiple of 8.  Guarantees:
      * tile_r is a multiple of 8 and <= _MAX_TILE_ROWS,
      * the last grid tile starts strictly inside the array (no fully-OOB DMA),
      * all tiles except the global last one contain only valid elements.
    """
    if rows <= _MAX_TILE_ROWS:
        return 1, 1, rows
    if rows >= _SPLIT_MIN_ROWS:
        # Even total tile count so both v7x TensorCores get an equal,
        # rectangular share of the grid.
        total_tiles = _round_up(pl.cdiv(rows, _MAX_TILE_ROWS), 2)
        tile_r = min(_MAX_TILE_ROWS, _round_up(pl.cdiv(rows, total_tiles), 8))
        if (total_tiles - 1) * tile_r < rows:  # static no-fully-OOB check
            return 2, total_tiles // 2, tile_r
    tile_r = _MAX_TILE_ROWS
    return 1, pl.cdiv(rows, tile_r), tile_r


def _make_kernel(tile_r: int, needs_mask: bool, remaining: int):
    """Build the kernel with the tile geometry / mask constants baked in."""

    def kernel(x_ref, part_ref):
        # x_ref:    (tile_r, 128) logits tile in VMEM (input dtype)
        # part_ref: (8, 128) f32 partial-sum block, resident across the inner
        #           grid axis for the current split (doubles as accumulator).
        t = pl.program_id(1)

        @pl.when(t == 0)
        def _init():
            part_ref[...] = jnp.zeros_like(part_ref)

        x = x_ref[...].astype(jnp.float32)
        # Numerically-stable BCE-with-logits against target = 1:
        #   loss = max(-x, 0) + log1p(exp(-|x|)) == softplus(-x)
        per_elem = jnp.maximum(-x, 0.0) + jnp.log1p(jnp.exp(-jnp.abs(x)))

        def _accumulate(vals):
            # Tree-add the tile's vregs down to a single (8, 128) block before
            # touching the accumulator: 4 KiB of accumulator traffic per step.
            part_ref[...] += vals.reshape(tile_r // 8, 8, _LANES).sum(axis=0)

        if not needs_mask:
            # Element count exactly fills the grid: no masking anywhere.
            _accumulate(per_elem)
        else:
            is_last = jnp.logical_and(
                pl.program_id(0) == pl.num_programs(0) - 1,
                t == pl.num_programs(1) - 1)

            @pl.when(jnp.logical_not(is_last))
            def _interior():
                _accumulate(per_elem)

            @pl.when(is_last)
            def _ragged():
                # Tile-local flat index vs. baked-in remaining-valid count.
                row = lax.broadcasted_iota(jnp.int32, (tile_r, _LANES), 0)
                col = lax.broadcasted_iota(jnp.int32, (tile_r, _LANES), 1)
                idx = row * _LANES + col
                # Select-mask (not multiply-by-0) so NaN/Inf garbage from the
                # ragged HBM read / zero-padding cannot leak into the sum.
                _accumulate(jnp.where(idx < remaining, per_elem, 0.0))

    return kernel


def gan_g_loss(scores_fake: jax.Array) -> jax.Array:
    """GAN generator loss: mean(softplus(-scores_fake)) over all elements."""
    flat = scores_fake.reshape(-1)
    n = flat.shape[0]

    # Lane-dense (rows, 128) view with rows a multiple of 8.  When
    # n % 1024 == 0 (common case, incl. the test shape) no padding/copy occurs.
    padded = _round_up(max(n, 1), 8 * _LANES)
    if padded != n:
        flat = jnp.pad(flat, (0, padded - n))
    rows = padded // _LANES
    x2d = flat.reshape(rows, _LANES)

    num_splits, tiles_per_split, tile_r = _choose_tiling(rows)
    total_elems = num_splits * tiles_per_split * tile_r * _LANES
    needs_mask = total_elems != n
    # Valid elements inside the global last tile (Python int constant; may be
    # <= 0 if the last tile is pure padding, in which case it contributes 0).
    remaining = n - (num_splits * tiles_per_split - 1) * tile_r * _LANES

    kernel = _make_kernel(tile_r, needs_mask, remaining)

    partials = pl.pallas_call(
        kernel,
        out_shape=jax.ShapeDtypeStruct((num_splits * 8, _LANES), jnp.float32),
        grid_spec=pltpu.PrefetchScalarGridSpec(
            num_scalar_prefetch=0,
            grid=(num_splits, tiles_per_split),
            in_specs=[
                # NOTE: sweep pipeline_mode=pl.Buffered(3) on real HW if DMA
                # issue jitter shows up at tile boundaries; 2 buffers default.
                pl.BlockSpec(
                    (tile_r, _LANES),
                    lambda s, t, _tps=tiles_per_split: (s * _tps + t, 0)),
            ],
            out_specs=pl.BlockSpec((8, _LANES), lambda s, t: (s, 0)),
        ),
        compiler_params=pltpu.CompilerParams(
            dimension_semantics=("parallel", "arbitrary"),
            vmem_limit_bytes=32 * 1024 * 1024),
    )(x2d)

    # Combine per-split partial sums and divide by the true element count.
    return jnp.sum(partials) / jnp.float32(n)


def _reference(scores_fake: jax.Array) -> jax.Array:
    x = scores_fake.astype(jnp.float32)
    return jnp.mean(jnp.maximum(-x, 0.0) + jnp.log1p(jnp.exp(-jnp.abs(x))))


if __name__ == "__main__":
    key = jax.random.PRNGKey(0)
    # Typical discriminator scores for fake samples, e.g. (B, C, H, W) logits.
    scores_fake = jax.random.normal(key, (2, 4, 16, 16), dtype=jnp.float32)

    loss = jax.jit(gan_g_loss)(scores_fake)
    jax.block_until_ready(loss)
    ref = _reference(scores_fake)
    assert jnp.allclose(loss, ref, atol=1e-5, rtol=1e-5), (loss, ref)

    # Ragged / padded path (exercises the masked last tile).
    ragged = jax.random.normal(jax.random.PRNGKey(1), (3, 5, 7),
                               dtype=jnp.float32)
    loss_r = jax.jit(gan_g_loss)(ragged)
    jax.block_until_ready(loss_r)
    ref_r = _reference(ragged)
    assert jnp.allclose(loss_r, ref_r, atol=1e-5, rtol=1e-5), (loss_r, ref_r)

    print("KERNEL_OK")
</pallas_src>

<mosaic_0001>
module attributes {stable_mosaic.version = 11 : i64} {
  func.func @kernel(%arg0: i32, %arg1: i32, %arg2: memref<16x128xf32, #tpu.memory_space<vmem>>, %arg3: memref<8x128xf32, #tpu.memory_space<vmem>>) attributes {dimension_semantics = [#tpu.dimension_semantics<parallel>, #tpu.dimension_semantics<arbitrary>], iteration_bounds = array<i64: 1, 1>, scalar_prefetch = 0 : i64, scratch_operands = 0 : i64, tpu.core_type = #tpu.core_type<tc>, window_params = [{transform_indices = @transform_0, window_bounds = array<i64: 16, 128>}, {transform_indices = @transform_1, window_bounds = array<i64: 8, 128>}]} {
    %c0_i32 = arith.constant 0 : i32
    %0 = arith.cmpi eq, %arg1, %c0_i32 : i32
    %1 = arith.extui %0 : i1 to i32
    %c0_i32_0 = arith.constant 0 : i32
    %2 = arith.cmpi ne, %1, %c0_i32_0 : i32
    scf.if %2 {
      %cst_9 = arith.constant 0.000000e+00 : f32
      %19 = vector.broadcast %cst_9 : f32 to vector<8x128xf32>
      %c0_10 = arith.constant 0 : index
      %c0_11 = arith.constant 0 : index
      %20 = vector.load %arg3[%c0_10, %c0_11] : memref<8x128xf32, #tpu.memory_space<vmem>>, vector<8x128xf32>
      tpu.vector_store %arg3[%c0_10, %c0_11], %19 {strides = array<i32>} : memref<8x128xf32, #tpu.memory_space<vmem>>, vector<8x128xf32>,
    } else {
    }
    %c0 = arith.constant 0 : index
    %c0_1 = arith.constant 0 : index
    %3 = vector.load %arg2[%c0, %c0_1] : memref<16x128xf32, #tpu.memory_space<vmem>>, vector<16x128xf32>
    %cst = arith.constant 0.000000e+00 : f32
    %4 = vector.broadcast %cst : f32 to vector<16x128xf32>
    %5 = arith.subf %4, %3 : vector<16x128xf32>
    %cst_2 = arith.constant 0.000000e+00 : f32
    %6 = vector.broadcast %cst_2 : f32 to vector<16x128xf32>
    %7 = arith.maximumf %5, %6 : vector<16x128xf32>
    %8 = math.absf %3 : vector<16x128xf32>
    %cst_3 = arith.constant 0.000000e+00 : f32
    %9 = vector.broadcast %cst_3 : f32 to vector<16x128xf32>
    %10 = arith.subf %9, %8 : vector<16x128xf32>
    %11 = math.exp %10 : vector<16x128xf32>
    %12 = math.log1p %11 : vector<16x128xf32>
    %13 = arith.addf %7, %12 : vector<16x128xf32>
    %c0_4 = arith.constant 0 : index
    %c0_5 = arith.constant 0 : index
    %14 = vector.load %arg3[%c0_4, %c0_5] : memref<8x128xf32, #tpu.memory_space<vmem>>, vector<8x128xf32>
    %15 = vector.shape_cast %13 : vector<16x128xf32> to vector<2x8x128xf32>
    %cst_6 = arith.constant dense<0.000000e+00> : vector<8x128xf32>
    %16 = vector.multi_reduction <add>, %15, %cst_6 [0] : vector<2x8x128xf32> to vector<8x128xf32>
    %17 = arith.addf %14, %16 : vector<8x128xf32>
    %c0_7 = arith.constant 0 : index
    %c0_8 = arith.constant 0 : index
    %18 = vector.load %arg3[%c0_7, %c0_8] : memref<8x128xf32, #tpu.memory_space<vmem>>, vector<8x128xf32>
    tpu.vector_store %arg3[%c0_7, %c0_8], %17 {strides = array<i32>} : memref<8x128xf32, #tpu.memory_space<vmem>>, vector<8x128xf32>,
    return
  }
  func.func @transform_0(%arg0: i32, %arg1: i32) -> (i32, i32) {
    %c1_i32 = arith.constant 1 : i32
    %0 = arith.muli %arg0, %c1_i32 : i32
    %1 = arith.addi %0, %arg1 : i32
    %c0_i32 = arith.constant 0 : i32
    %c0_i32_0 = arith.constant 0 : i32
    return %1, %c0_i32 : i32, i32
  }
  func.func @transform_1(%arg0: i32, %arg1: i32) -> (i32, i32) {
    %c0_i32 = arith.constant 0 : i32
    %c0_i32_0 = arith.constant 0 : i32
    return %arg0, %c0_i32 : i32, i32
  }
}

</mosaic_0001>

<bundles_post_ra>
// kernel: gan_g_loss.1
= control target key start
LH: loop header
LB: loop body
LE: loop exit
PB: predicated region body
PF: predicated region fallthrough
CT: control target
= control target key end

     0   :  { %s111_s0 = inlined_call_operand.vmem [shape: f32[16,128], index: 0, kind: input, shape index: {}]   ;;  %s112_s1 = inlined_call_operand.vmem [shape: f32[8,128], index: 1, kind: output, shape index: {}]  }
   0x1   :  { %v35_v0 = vld [vmem:[%s111_s0] sm:$0xff]  ;;  %v36_v1 = vld [vmem:[%s111_s0 + $0x8] sm:$0xff] }
   0x2   :  { %v41_v2 = vand.u32 2147483647, %v35_v0  ;;  %v42_v3 = vand.u32 2147483647, %v36_v1  ;;  %v37_v15 = vsub.f32 0.0, %v35_v0  ;;  %v38_v18 = vsub.f32 0.0, %v36_v1 }
   0x4   :  { %v43_v4 = vsub.f32 0.0, %v41_v2  ;;  %v44_v5 = vsub.f32 0.0, %v42_v3  ;;  %v39_v22 = vmax.f32 %v37_v15, 0.0  ;;  %v40_v25 = vmax.f32 %v38_v18, 0.0 }
   0x6   :  { %v45_v6 = vmul.f32 1.442695, %v43_v4  ;;  %v47_v7 = vmul.f32 1.442695, %v44_v5 }
   0x8   :  { %84 = vpow2.f32 %v45_v6 }
   0x9   :  { %86 = vpow2.f32 %v47_v7 }
  0x15   :  { %v85_v8 = vpop.eup %84 }
  0x16   :  { %v87_v9 = vpop.eup %86  ;;  %v49_v10 = vadd.f32 1.0, %v85_v8  ;;  %v52_v12 = vmul.f32 -0.5, %v85_v8  ;;  %v55_v16 = vand.u32 2147483647, %v85_v8 }
  0x17   :  { %v58_v11 = vadd.f32 1.0, %v87_v9  ;;  %v61_v13 = vmul.f32 -0.5, %v87_v9  ;;  %v64_v19 = vand.u32 2147483647, %v87_v9 }
  0x18   :  { %88 = vlog2.f32 %v49_v10  ;;  %v53_v14 = vadd.f32 1.0, %v52_v12  ;;  %vm56_vm0 = vcmp.lt.f32.partialorder %v55_v16, 0.0004427343 }
  0x19   :  { %90 = vlog2.f32 %v58_v11  ;;  %v62_v17 = vadd.f32 1.0, %v61_v13  ;;  %vm65_vm1 = vcmp.lt.f32.partialorder %v64_v19, 0.0004427343 }
  0x1a   :  { %v54_v20 = vmul.f32 %v85_v8, %v53_v14 }
  0x1b   :  { %v63_v23 = vmul.f32 %v87_v9, %v62_v17 }
  0x25   :  { %v89_v21 = vpop.eup %88 }
  0x26   :  { %v91_v24 = vpop.eup %90  ;;  %v51_v26 = vmul.f32 0.6931472, %v89_v21 }
  0x27   :  { %v60_v27 = vmul.f32 0.6931472, %v91_v24 }
  0x28   :  { %v57_v28 = vsel %vm56_vm0, %v54_v20, %v51_v26 }
  0x29   :  { %v66_v29 = vsel %vm65_vm1, %v63_v23, %v60_v27  ;;  %v67_v30 = vadd.f32 %v57_v28, %v39_v22 }
  0x2a   :  { %v68_v31 = vadd.f32 %v66_v29, %v40_v25 }
  0x2c   :  { %v70_v32 = vadd.f32 %v68_v31, %v67_v30 }
  0x2e   :  { %72 = vst [vmem:[%s112_s1] sm:$0xff] %v70_v32 }

</bundles_post_ra>
